<compile_context>
chip_gen: v5e
topology: v5e:2x2
jax: 0.10.0
libtpu: 0.0.40
codegen_flags: <defaults>
</compile_context>

<pallas_src>
import functools

import jax
import jax.numpy as jnp
from jax.experimental import pallas as pl
from jax.experimental.pallas import tpu as pltpu

LANE = 128
SUBLANE = 8


def _round_up(n, m):
    return ((n + m - 1) // m) * m


# ---------------------------------------------------------------------------
# Fused kernel: encoder-linear (mu) -> MLP(64, 64) -> outdim, all 128-padded.
# One grid step processes a (TB, D) batch tile; weights stay resident in VMEM.
# ---------------------------------------------------------------------------
def vae_regression_head_kernel(
    x_ref,            # (TB, Dp)   bf16  flattened + padded input tile
    we_ref, be_ref,   # (Dp, Zp)   bf16 / (1, Zp) f32   synthetic VAE mu head
    w1_ref, b1_ref,   # (Zp, H1p)  bf16 / (1, H1p) f32  MLP hidden 1
    w2_ref, b2_ref,   # (H1p, H2p) bf16 / (1, H2p) f32  MLP hidden 2
    w3_ref, b3_ref,   # (H2p, Op)  bf16 / (1, Op) f32   MLP output
    o_ref,            # (TB, Op)   f32
):
    x = x_ref[...]  # already bf16

    # h = vae.encode(x, True): deterministic mu projection (bf16 MXU, f32 acc).
    h = jnp.dot(x, we_ref[...], preferred_element_type=jnp.float32) + be_ref[...]

    # h.view(B, -1) is a no-op on the flattened layout.

    h1 = jnp.maximum(
        jnp.dot(h.astype(jnp.bfloat16), w1_ref[...],
                preferred_element_type=jnp.float32) + b1_ref[...],
        0.0,
    )
    h2 = jnp.maximum(
        jnp.dot(h1.astype(jnp.bfloat16), w2_ref[...],
                preferred_element_type=jnp.float32) + b2_ref[...],
        0.0,
    )
    out = jnp.dot(h2.astype(jnp.bfloat16), w3_ref[...],
                  preferred_element_type=jnp.float32) + b3_ref[...]

    o_ref[...] = out.astype(o_ref.dtype)


# ---------------------------------------------------------------------------
# Wrapper: flatten / pad / cast, grid over batch, slice the padded output.
# ---------------------------------------------------------------------------
@functools.partial(jax.jit, static_argnames=("outdim", "batch_tile"))
def vae_regression_head(x, padded_params, *, outdim, batch_tile=256):
    B = x.shape[0]
    x_flat = x.reshape(B, -1).astype(jnp.bfloat16)   # torch .view(B, -1)
    d_in = x_flat.shape[1]

    we, be, w1, b1, w2, b2, w3, b3 = padded_params
    d_pad = we.shape[0]
    o_pad = w3.shape[1]

    # Pad input feature dim to the padded encoder fan-in (zeros are inert).
    if d_pad != d_in:
        x_flat = jnp.pad(x_flat, ((0, 0), (0, d_pad - d_in)))

    # Batch tile: 8-row aligned, capped at `batch_tile` (keeps the f32
    # intermediates of the fused 4-matmul chain inside the vreg file on v6e
    # and well under the 32 MiB scoped VMEM on v7x).
    b_al = _round_up(B, SUBLANE)
    tb = batch_tile if b_al >= batch_tile else b_al
    b_pad = _round_up(b_al, tb)
    if b_pad != B:
        x_flat = jnp.pad(x_flat, ((0, b_pad - B), (0, 0)))

    grid = (b_pad // tb,)

    def batch_map(i):          # x / out tiles walk the batch axis
        return (i, 0)

    def resident_map(i):       # weights & biases: same block every step
        return (0, 0)

    weight_args = (we, be, w1, b1, w2, b2, w3, b3)
    in_specs = [pl.BlockSpec((tb, d_pad), batch_map)] + [
        pl.BlockSpec(w.shape, resident_map) for w in weight_args
    ]

    zp, h1p, h2p = we.shape[1], w1.shape[1], w2.shape[1]
    flops = 2 * b_pad * (d_pad * zp + zp * h1p + h1p * h2p + h2p * o_pad)
    bytes_accessed = (
        x_flat.size * x_flat.dtype.itemsize
        + sum(w.size * w.dtype.itemsize for w in weight_args)
        + b_pad * o_pad * 4
    )

    out_pad = pl.pallas_call(
        vae_regression_head_kernel,
        out_shape=jax.ShapeDtypeStruct((b_pad, o_pad), jnp.float32),
        grid=grid,
        in_specs=in_specs,
        out_specs=pl.BlockSpec((tb, o_pad), batch_map),
        compiler_params=pltpu.CompilerParams(
            dimension_semantics=("parallel",),      # megacore split on v7x
            vmem_limit_bytes=32 * 1024 * 1024,
        ),
        cost_estimate=pl.CostEstimate(
            flops=flops, transcendentals=0, bytes_accessed=bytes_accessed
        ),
    )(x_flat, *weight_args)

    return out_pad[:B, :outdim]


# ---------------------------------------------------------------------------
# Deterministic parameter construction (synthetic, not a checkpoint load).
# ---------------------------------------------------------------------------
def make_params(key, d_in, latent_len, latent_dim, mlp_hidden, outdim):
    z = latent_len * latent_dim
    dims = [(d_in, z), (z, mlp_hidden[0]), (mlp_hidden[0], mlp_hidden[1]),
            (mlp_hidden[1], outdim)]
    names = ["e", "1", "2", "3"]
    params = {}
    for name, (fan_in, fan_out) in zip(names, dims):
        key, kw, kb = jax.random.split(key, 3)
        scale = 1.0 / jnp.sqrt(jnp.float32(fan_in))
        params[f"w{name}"] = jax.random.uniform(
            kw, (fan_in, fan_out), jnp.float32, -scale, scale)
        params[f"b{name}"] = jax.random.uniform(
            kb, (1, fan_out), jnp.float32, -scale, scale)
    return params


def pad_and_cast_params(params):
    """Zero-pad every weight/bias to 128-lane multiples; weights -> bf16."""
    def pad2(a, rows, cols):
        return jnp.pad(a, ((0, rows - a.shape[0]), (0, cols - a.shape[1])))

    out = []
    for name in ["e", "1", "2", "3"]:
        w = params[f"w{name}"]
        b = params[f"b{name}"]
        r = _round_up(w.shape[0], LANE)
        c = _round_up(w.shape[1], LANE)
        out.append(pad2(w, r, c).astype(jnp.bfloat16))   # MXU operand path
        out.append(pad2(b, 1, c).astype(jnp.float32))    # bias adds stay f32
    return tuple(out)


def reference_forward(x, params):
    """Pure-JAX reference with the same bf16-operand / f32-accumulate scheme."""
    x_flat = x.reshape(x.shape[0], -1)

    def mm(a, w):
        return jnp.dot(a.astype(jnp.bfloat16), w.astype(jnp.bfloat16),
                       preferred_element_type=jnp.float32)

    h = mm(x_flat, params["we"]) + params["be"]
    h1 = jnp.maximum(mm(h, params["w1"]) + params["b1"], 0.0)
    h2 = jnp.maximum(mm(h1, params["w2"]) + params["b2"], 0.0)
    return mm(h2, params["w3"]) + params["b3"]


if __name__ == "__main__":
    # Small shapes consistent with the module:
    #   x: (B, C, L) = (2, 4, 16)  -> flattened D_in = 64
    #   vae.latent_len = 8, vae.latent_dim = 4 -> Z = 32
    #   MLPlatent = [64, 64], outdim = 2
    B, C, L = 2, 4, 16
    latent_len, latent_dim = 8, 4
    mlp_hidden = [64, 64]
    outdim = 2

    key = jax.random.PRNGKey(0)
    key, kx = jax.random.split(key)
    x = jax.random.normal(kx, (B, C, L), jnp.float32)

    params = make_params(key, C * L, latent_len, latent_dim, mlp_hidden, outdim)
    padded_params = pad_and_cast_params(params)

    out = vae_regression_head(x, padded_params, outdim=outdim)
    out = jax.block_until_ready(out)

    ref = reference_forward(x, params)
    assert out.shape == (B, outdim), out.shape
    assert jnp.allclose(out, ref, atol=1e-2, rtol=1e-2), (
        "mismatch vs JAX reference, max abs err "
        f"{float(jnp.max(jnp.abs(out - ref)))}")

    print("KERNEL_OK")
</pallas_src>

<mosaic_0001>
module attributes {stable_mosaic.version = 11 : i64} {
  func.func @vae_regression_head_kernel(%arg0: i32, %arg1: memref<8x128xbf16, #tpu.memory_space<vmem>>, %arg2: memref<128x128xbf16, #tpu.memory_space<vmem>>, %arg3: memref<1x128xf32, #tpu.memory_space<vmem>>, %arg4: memref<128x128xbf16, #tpu.memory_space<vmem>>, %arg5: memref<1x128xf32, #tpu.memory_space<vmem>>, %arg6: memref<128x128xbf16, #tpu.memory_space<vmem>>, %arg7: memref<1x128xf32, #tpu.memory_space<vmem>>, %arg8: memref<128x128xbf16, #tpu.memory_space<vmem>>, %arg9: memref<1x128xf32, #tpu.memory_space<vmem>>, %arg10: memref<8x128xf32, #tpu.memory_space<vmem>>) attributes {dimension_semantics = [#tpu.dimension_semantics<parallel>], iteration_bounds = array<i64: 1>, scalar_prefetch = 0 : i64, scratch_operands = 0 : i64, tpu.core_type = #tpu.core_type<tc>, window_params = [{transform_indices = @transform_0, window_bounds = array<i64: 8, 128>}, {pipeline_mode = #tpu.pipeline_mode<synchronous>, transform_indices = @transform_1, window_bounds = array<i64: 128, 128>}, {pipeline_mode = #tpu.pipeline_mode<synchronous>, transform_indices = @transform_2, window_bounds = array<i64: 1, 128>}, {pipeline_mode = #tpu.pipeline_mode<synchronous>, transform_indices = @transform_3, window_bounds = array<i64: 128, 128>}, {pipeline_mode = #tpu.pipeline_mode<synchronous>, transform_indices = @transform_4, window_bounds = array<i64: 1, 128>}, {pipeline_mode = #tpu.pipeline_mode<synchronous>, transform_indices = @transform_5, window_bounds = array<i64: 128, 128>}, {pipeline_mode = #tpu.pipeline_mode<synchronous>, transform_indices = @transform_6, window_bounds = array<i64: 1, 128>}, {pipeline_mode = #tpu.pipeline_mode<synchronous>, transform_indices = @transform_7, window_bounds = array<i64: 128, 128>}, {pipeline_mode = #tpu.pipeline_mode<synchronous>, transform_indices = @transform_8, window_bounds = array<i64: 1, 128>}, {transform_indices = @transform_9, window_bounds = array<i64: 8, 128>}]} {
    %c0 = arith.constant 0 : index
    %c0_0 = arith.constant 0 : index
    %0 = vector.load %arg1[%c0, %c0_0] : memref<8x128xbf16, #tpu.memory_space<vmem>>, vector<8x128xbf16>
    %c0_1 = arith.constant 0 : index
    %c0_2 = arith.constant 0 : index
    %1 = vector.load %arg2[%c0_1, %c0_2] : memref<128x128xbf16, #tpu.memory_space<vmem>>, vector<128x128xbf16>
    %cst = arith.constant dense<0.000000e+00> : vector<8x128xf32>
    %2 = tpu.matmul %0, %1, %cst {dimension_numbers = #tpu.dot_dimension_numbers<[1], [0], [0], [1], [0, 0, 1, 1], [], []>} : vector<8x128xbf16>, vector<128x128xbf16>, vector<8x128xf32> -> vector<8x128xf32>
    %c0_3 = arith.constant 0 : index
    %c0_4 = arith.constant 0 : index
    %3 = vector.load %arg3[%c0_3, %c0_4] : memref<1x128xf32, #tpu.memory_space<vmem>>, vector<1x128xf32>
    %4 = vector.broadcast %3 : vector<1x128xf32> to vector<8x128xf32>
    %5 = arith.addf %2, %4 : vector<8x128xf32>
    %6 = arith.truncf %5 : vector<8x128xf32> to vector<8x128xbf16>
    %c0_5 = arith.constant 0 : index
    %c0_6 = arith.constant 0 : index
    %7 = vector.load %arg4[%c0_5, %c0_6] : memref<128x128xbf16, #tpu.memory_space<vmem>>, vector<128x128xbf16>
    %cst_7 = arith.constant dense<0.000000e+00> : vector<8x128xf32>
    %8 = tpu.matmul %6, %7, %cst_7 {dimension_numbers = #tpu.dot_dimension_numbers<[1], [0], [0], [1], [0, 0, 1, 1], [], []>} : vector<8x128xbf16>, vector<128x128xbf16>, vector<8x128xf32> -> vector<8x128xf32>
    %c0_8 = arith.constant 0 : index
    %c0_9 = arith.constant 0 : index
    %9 = vector.load %arg5[%c0_8, %c0_9] : memref<1x128xf32, #tpu.memory_space<vmem>>, vector<1x128xf32>
    %10 = vector.broadcast %9 : vector<1x128xf32> to vector<8x128xf32>
    %11 = arith.addf %8, %10 : vector<8x128xf32>
    %cst_10 = arith.constant 0.000000e+00 : f32
    %12 = vector.broadcast %cst_10 : f32 to vector<8x128xf32>
    %13 = arith.maximumf %11, %12 : vector<8x128xf32>
    %14 = arith.truncf %13 : vector<8x128xf32> to vector<8x128xbf16>
    %c0_11 = arith.constant 0 : index
    %c0_12 = arith.constant 0 : index
    %15 = vector.load %arg6[%c0_11, %c0_12] : memref<128x128xbf16, #tpu.memory_space<vmem>>, vector<128x128xbf16>
    %cst_13 = arith.constant dense<0.000000e+00> : vector<8x128xf32>
    %16 = tpu.matmul %14, %15, %cst_13 {dimension_numbers = #tpu.dot_dimension_numbers<[1], [0], [0], [1], [0, 0, 1, 1], [], []>} : vector<8x128xbf16>, vector<128x128xbf16>, vector<8x128xf32> -> vector<8x128xf32>
    %c0_14 = arith.constant 0 : index
    %c0_15 = arith.constant 0 : index
    %17 = vector.load %arg7[%c0_14, %c0_15] : memref<1x128xf32, #tpu.memory_space<vmem>>, vector<1x128xf32>
    %18 = vector.broadcast %17 : vector<1x128xf32> to vector<8x128xf32>
    %19 = arith.addf %16, %18 : vector<8x128xf32>
    %cst_16 = arith.constant 0.000000e+00 : f32
    %20 = vector.broadcast %cst_16 : f32 to vector<8x128xf32>
    %21 = arith.maximumf %19, %20 : vector<8x128xf32>
    %22 = arith.truncf %21 : vector<8x128xf32> to vector<8x128xbf16>
    %c0_17 = arith.constant 0 : index
    %c0_18 = arith.constant 0 : index
    %23 = vector.load %arg8[%c0_17, %c0_18] : memref<128x128xbf16, #tpu.memory_space<vmem>>, vector<128x128xbf16>
    %cst_19 = arith.constant dense<0.000000e+00> : vector<8x128xf32>
    %24 = tpu.matmul %22, %23, %cst_19 {dimension_numbers = #tpu.dot_dimension_numbers<[1], [0], [0], [1], [0, 0, 1, 1], [], []>} : vector<8x128xbf16>, vector<128x128xbf16>, vector<8x128xf32> -> vector<8x128xf32>
    %c0_20 = arith.constant 0 : index
    %c0_21 = arith.constant 0 : index
    %25 = vector.load %arg9[%c0_20, %c0_21] : memref<1x128xf32, #tpu.memory_space<vmem>>, vector<1x128xf32>
    %26 = vector.broadcast %25 : vector<1x128xf32> to vector<8x128xf32>
    %27 = arith.addf %24, %26 : vector<8x128xf32>
    %c0_22 = arith.constant 0 : index
    %c0_23 = arith.constant 0 : index
    %28 = vector.load %arg10[%c0_22, %c0_23] : memref<8x128xf32, #tpu.memory_space<vmem>>, vector<8x128xf32>
    tpu.vector_store %arg10[%c0_22, %c0_23], %27 {strides = array<i32>} : memref<8x128xf32, #tpu.memory_space<vmem>>, vector<8x128xf32>,
    return
  }
  func.func @transform_0(%arg0: i32) -> (i32, i32) {
    %c0_i32 = arith.constant 0 : i32
    %c0_i32_0 = arith.constant 0 : i32
    return %arg0, %c0_i32 : i32, i32
  }
  func.func @transform_1(%arg0: i32) -> (i32, i32) {
    %c0_i32 = arith.constant 0 : i32
    %c0_i32_0 = arith.constant 0 : i32
    %c0_i32_1 = arith.constant 0 : i32
    return %c0_i32, %c0_i32_0 : i32, i32
  }
  func.func @transform_2(%arg0: i32) -> (i32, i32) {
    %c0_i32 = arith.constant 0 : i32
    %c0_i32_0 = arith.constant 0 : i32
    %c0_i32_1 = arith.constant 0 : i32
    return %c0_i32, %c0_i32_0 : i32, i32
  }
  func.func @transform_3(%arg0: i32) -> (i32, i32) {
    %c0_i32 = arith.constant 0 : i32
    %c0_i32_0 = arith.constant 0 : i32
    %c0_i32_1 = arith.constant 0 : i32
    return %c0_i32, %c0_i32_0 : i32, i32
  }
  func.func @transform_4(%arg0: i32) -> (i32, i32) {
    %c0_i32 = arith.constant 0 : i32
    %c0_i32_0 = arith.constant 0 : i32
    %c0_i32_1 = arith.constant 0 : i32
    return %c0_i32, %c0_i32_0 : i32, i32
  }
  func.func @transform_5(%arg0: i32) -> (i32, i32) {
    %c0_i32 = arith.constant 0 : i32
    %c0_i32_0 = arith.constant 0 : i32
    %c0_i32_1 = arith.constant 0 : i32
    return %c0_i32, %c0_i32_0 : i32, i32
  }
  func.func @transform_6(%arg0: i32) -> (i32, i32) {
    %c0_i32 = arith.constant 0 : i32
    %c0_i32_0 = arith.constant 0 : i32
    %c0_i32_1 = arith.constant 0 : i32
    return %c0_i32, %c0_i32_0 : i32, i32
  }
  func.func @transform_7(%arg0: i32) -> (i32, i32) {
    %c0_i32 = arith.constant 0 : i32
    %c0_i32_0 = arith.constant 0 : i32
    %c0_i32_1 = arith.constant 0 : i32
    return %c0_i32, %c0_i32_0 : i32, i32
  }
  func.func @transform_8(%arg0: i32) -> (i32, i32) {
    %c0_i32 = arith.constant 0 : i32
    %c0_i32_0 = arith.constant 0 : i32
    %c0_i32_1 = arith.constant 0 : i32
    return %c0_i32, %c0_i32_0 : i32, i32
  }
  func.func @transform_9(%arg0: i32) -> (i32, i32) {
    %c0_i32 = arith.constant 0 : i32
    %c0_i32_0 = arith.constant 0 : i32
    return %arg0, %c0_i32 : i32, i32
  }
}

</mosaic_0001>

<bundles_post_ra>
// kernel: vae_regression_head.1
= control target key start
LH: loop header
LB: loop body
LE: loop exit
PB: predicated region body
PF: predicated region fallthrough
CT: control target
= control target key end

     0   :  { %14 = vsyncpa [#allocation3], 0  ;;  %s791_s0 = inlined_call_operand.vmem [shape: bf16[8,128], index: 0, kind: input, shape index: {}]   ;;  %s792_s1 = inlined_call_operand.hbm [shape: bf16[128,128], index: 1, kind: input, shape index: {}]   ;;  %s793_s2 = inlined_call_operand.vmem [shape: f32[1,128], index: 2, kind: input, shape index: {}]   ;;  %s794_s3 = inlined_call_operand.hbm [shape: bf16[128,128], index: 3, kind: input, shape index: {}]   ;;  %s795_s4 = inlined_call_operand.vmem [shape: f32[1,128], index: 4, kind: input, shape index: {}]   ;;  %s796_s5 = inlined_call_operand.hbm [shape: bf16[128,128], index: 5, kind: input, shape index: {}]   ;;  %s797_s6 = inlined_call_operand.vmem [shape: f32[1,128], index: 6, kind: input, shape index: {}]   ;;  %s798_s7 = inlined_call_operand.hbm [shape: bf16[128,128], index: 7, kind: input, shape index: {}]   ;;  %s799_s8 = inlined_call_operand.vmem [shape: f32[1,128], index: 8, kind: input, shape index: {}]   ;;  %s800_s9 = inlined_call_operand.vmem [shape: f32[8,128], index: 9, kind: output, shape index: {}]  }
   0x1   :  { %15 = vsyncpa [#allocation5], 0 }
   0x2   :  { %16 = vsyncpa [#allocation8], 0  ;;  %s38_s11 = sshll.u32 %s794_s3, 4  ;;  %s705_s12 = smov [#allocation4]   ;;  %s39_s11 = int_to_ptr.hbm [resolvable:$true] %s38_s11 }
   0x3   :  { %s40_s13 = sshll.u32 %s705_s12, 4  ;;  %s23_s16 = sshll.u32 %s792_s1, 4  ;;  %s41_s13 = int_to_ptr.vmem [resolvable:$true] %s40_s13  ;;  %s24_s16 = int_to_ptr.hbm [resolvable:$true] %s23_s16 }
   0x4   :  { %s706_s17 = smov 64   ;;  %s707_s18 = smov 4  }
   0x5   :  { %46 = dma.hbm_to_vmem [thread:$0]  %s39_s11, 1024, %s41_s13, [#allocation5], %s706_s17, %s706_s17, %s707_s18  }
   0x6   :  { %s708_s19 = smov [#allocation2]   ;;  %s53_s23 = sshll.u32 %s796_s5, 4  ;;  %s54_s23 = int_to_ptr.hbm [resolvable:$true] %s53_s23 }
   0x7   :  { %s25_s20 = sshll.u32 %s708_s19, 4  ;;  %s68_s25 = sshll.u32 %s798_s7, 4  ;;  %s26_s20 = int_to_ptr.vmem [resolvable:$true] %s25_s20  ;;  %s69_s25 = int_to_ptr.hbm [resolvable:$true] %s68_s25 }
   0x8   :  { %31 = dma.hbm_to_vmem [thread:$0]  %s24_s16, 1024, %s26_s20, [#allocation3], %s706_s17, %s706_s17, %s707_s18  }
   0x9   :  { %s709_s26 = smov [#allocation6]   ;;  %s710_s1 = smov [#allocation7]  }
   0xa   :  { %s55_s27 = sshll.u32 %s709_s26, 4  ;;  %s70_s28 = sshll.u32 %s710_s1, 4  ;;  %s56_s27 = int_to_ptr.vmem [resolvable:$true] %s55_s27  ;;  %s71_s28 = int_to_ptr.vmem [resolvable:$true] %s70_s28 }
   0xb   :  { %61 = dma.hbm_to_vmem [thread:$0]  %s54_s23, 1024, %s56_s27, [#allocation5], %s706_s17, %s706_s17, %s707_s18  }
   0xc   :  { %76 = dma.hbm_to_vmem [thread:$0]  %s69_s25, 1024, %s71_s28, [#allocation8], %s706_s17, %s706_s17, %s707_s18  }
   0xd   :  { %699 = dma.done.wait [#allocation3], 1024  }
   0xe   :  { %700 = vsyncadd [#allocation3], 4294966272 }
   0xf   :  { %701 = dma.done.wait [#allocation5], 2048  }
  0x10   :  { %702 = vsyncadd [#allocation5], 4294965248 }
  0x11   :  { %703 = dma.done.wait [#allocation8], 1024  }
  0x12   :  { %704 = vsyncadd [#allocation8], 4294966272  ;;  %v568_v0 = vld [vmem:[#allocation2 + $0x38] sm:$0xff]  ;;  %v567_v1 = vld [vmem:[#allocation2 + $0x30] sm:$0xff] }
  0x13   :  { %164 = vmatpush.bf16.msra.mxu0 %v568_v0  ;;  %v576_v2 = vld [vmem:[#allocation4 + $0x38] sm:$0xff]  ;;  %v566_v3 = vld [vmem:[#allocation2 + $0x28] sm:$0xff]  ;;  %v575_v4 = vld [vmem:[#allocation4 + $0x30] sm:$0xff] }
  0x14   :  { %246 = vmatpush.bf16.msra.mxu1 %v576_v2  ;;  %v574_v5 = vld [vmem:[#allocation4 + $0x28] sm:$0xff]  ;;  %v565_v6 = vld [vmem:[#allocation2 + $0x20] sm:$0xff]  ;;  %v564_v8 = vld [vmem:[#allocation2 + $0x18] sm:$0xff] }
  0x15   :  { %v573_v7 = vld [vmem:[#allocation4 + $0x20] sm:$0xff]  ;;  %v572_v9 = vld [vmem:[#allocation4 + $0x18] sm:$0xff]  ;;  %v563_v10 = vld [vmem:[#allocation2 + $0x10] sm:$0xff] }
  0x16   :  { %v571_v11 = vld [vmem:[#allocation4 + $0x10] sm:$0xff]  ;;  %v562_v12 = vld [vmem:[#allocation2 + $0x8] sm:$0xff]  ;;  %v561_v14 = vld [vmem:[#allocation2] sm:$0xff] }
  0x17   :  { %165 = vmatpush.bf16.msra.mxu0 %v567_v1  ;;  %v570_v13 = vld [vmem:[#allocation4 + $0x8] sm:$0xff]  ;;  %v95_v15 = vld [vmem:[%s791_s0] sm:$0xf]  ;;  %v584_v17 = vld [vmem:[#allocation6 + $0x38] sm:$0xff] }
  0x18   :  { %247 = vmatpush.bf16.msra.mxu1 %v575_v4  ;;  %v569_v16 = vld [vmem:[#allocation4] sm:$0xff]  ;;  %329 = vmatpush.bf16.msra.mxu2 %v584_v17  ;;  %v583_v18 = vld [vmem:[#allocation6 + $0x30] sm:$0xff]  ;;  %v582_v19 = vld [vmem:[#allocation6 + $0x28] sm:$0xff] }
  0x19   :  { %v581_v20 = vld [vmem:[#allocation6 + $0x20] sm:$0xff]  ;;  %v580_v21 = vld [vmem:[#allocation6 + $0x18] sm:$0xff]  ;;  %v579_v22 = vld [vmem:[#allocation6 + $0x10] sm:$0xff] }
  0x1a   :  { %v599_v23 = vld [vmem:[%s793_s2] ss:$0 sm:$0xff]  ;;  %v578_v28 = vld [vmem:[#allocation6 + $0x8] sm:$0xff]  ;;  %v592_v30 = vld [vmem:[#allocation7 + $0x38] sm:$0xff] }
  0x1b   :  { %166 = vmatpush.bf16.msra.mxu0 %v566_v3  ;;  %v577_v29 = vld [vmem:[#allocation6] sm:$0xff]  ;;  %412 = vmatpush.bf16.msra.mxu3 %v592_v30  ;;  %v591_v31 = vld [vmem:[#allocation7 + $0x30] sm:$0xff]  ;;  %v590_v32 = vld [vmem:[#allocation7 + $0x28] sm:$0xff] }
  0x1c   :  { %248 = vmatpush.bf16.msra.mxu1 %v574_v5  ;;  %330 = vmatpush.bf16.msra.mxu2 %v583_v18  ;;  %v589_v33 = vld [vmem:[#allocation7 + $0x20] sm:$0xff]  ;;  %v588_v34 = vld [vmem:[#allocation7 + $0x18] sm:$0xff]  ;;  %v587_v35 = vld [vmem:[#allocation7 + $0x10] sm:$0xff] }
  0x1d   :  { %v600_v36 = vld [vmem:[%s795_s4] ss:$0 sm:$0xff]  ;;  %v586_v42 = vld [vmem:[#allocation7 + $0x8] sm:$0xff] }
  0x1e   :  { %v585_v43 = vld [vmem:[#allocation7] sm:$0xff] }
  0x1f   :  { %167 = vmatpush.bf16.msra.mxu0 %v565_v6  ;;  %413 = vmatpush.bf16.msra.mxu3 %v591_v31  ;;  %v601_v44 = vld [vmem:[%s797_s6] ss:$0 sm:$0xff] }
  0x20   :  { %249 = vmatpush.bf16.msra.mxu1 %v573_v7  ;;  %331 = vmatpush.bf16.msra.mxu2 %v582_v19  ;;  %v602_v50 = vld [vmem:[%s799_s8] ss:$0 sm:$0xff] }
  0x23   :  { %168 = vmatpush.bf16.msra.mxu0 %v564_v8  ;;  %414 = vmatpush.bf16.msra.mxu3 %v590_v32 }
  0x24   :  { %250 = vmatpush.bf16.msra.mxu1 %v572_v9  ;;  %332 = vmatpush.bf16.msra.mxu2 %v581_v20 }
  0x27   :  { %169 = vmatpush.bf16.msra.mxu0 %v563_v10  ;;  %415 = vmatpush.bf16.msra.mxu3 %v589_v33 }
  0x28   :  { %251 = vmatpush.bf16.msra.mxu1 %v571_v11  ;;  %333 = vmatpush.bf16.msra.mxu2 %v580_v21 }
  0x2b   :  { %170 = vmatpush.bf16.msra.mxu0 %v562_v12  ;;  %416 = vmatpush.bf16.msra.mxu3 %v588_v34 }
  0x2c   :  { %252 = vmatpush.bf16.msra.mxu1 %v570_v13  ;;  %334 = vmatpush.bf16.msra.mxu2 %v579_v22 }
  0x2f   :  { %171 = vmatpush.bf16.msra.mxu0 %v561_v14  ;;  %417 = vmatpush.bf16.msra.mxu3 %v587_v35 }
  0x30   :  { %253 = vmatpush.bf16.msra.mxu1 %v569_v16  ;;  %335 = vmatpush.bf16.msra.mxu2 %v578_v28 }
  0x32   :  { %172 = vmatmul.bf16.vlgmr.msra.gmra.mxu0 %v95_v15 }
  0x33   :  { %418 = vmatpush.bf16.msra.mxu3 %v586_v42 }
  0x34   :  { %336 = vmatpush.bf16.msra.mxu2 %v577_v29 }
  0x37   :  { %419 = vmatpush.bf16.msra.mxu3 %v585_v43 }
  0xaf   :  { %v173_v24 = vpop.f32.mrf.mxu0 }
  0xb0   :  { %v174_v25 = vadd.f32 %v599_v23, %v173_v24 }
  0xb2   :  { %v177_v26 = vpack.c.bf16 %v174_v25, %v174_v25 }
  0xb4   :  { %254 = vmatmul.bf16.vlgmr.msra.gmra.mxu1 %v177_v26 }
  0xb7   :  { %v175_v27 = vpop.f32.mrf.mxu0 }
 0x131   :  { %v255_v37 = vpop.f32.mrf.mxu1 }
 0x132   :  { %v256_v38 = vadd.f32 %v600_v36, %v255_v37 }
 0x134   :  { %v259_v39 = vmax.f32 %v256_v38, 0.0 }
 0x136   :  { %v260_v40 = vpack.c.bf16 %v259_v39, %v259_v39 }
 0x138   :  { %337 = vmatmul.bf16.vlgmr.msra.gmra.mxu2 %v260_v40 }
 0x139   :  { %v257_v41 = vpop.f32.mrf.mxu1 }
 0x1bb   :  { %v338_v45 = vpop.f32.mrf.mxu2 }
 0x1bc   :  { %v339_v46 = vadd.f32 %v601_v44, %v338_v45 }
 0x1be   :  { %v342_v47 = vmax.f32 %v339_v46, 0.0 }
 0x1c0   :  { %v343_v48 = vpack.c.bf16 %v342_v47, %v342_v47 }
 0x1c2   :  { %420 = vmatmul.bf16.vlgmr.msra.gmra.mxu3 %v343_v48 }
 0x1c3   :  { %v340_v49 = vpop.f32.mrf.mxu2 }
 0x245   :  { %v421_v51 = vpop.f32.mrf.mxu3 }
 0x246   :  { %v422_v52 = vadd.f32 %v602_v50, %v421_v51 }
 0x248   :  { %425 = vst [vmem:[%s800_s9] sm:$0xff] %v422_v52 }
 0x24d   :  { %v423_v53 = vpop.f32.mrf.mxu3 }
 0x24e   :  { %430 = vsyncpa [#allocation3], 1 }
 0x24f   :  { %431 = vsyncpa [#allocation5], 1 }
 0x250   :  { %432 = vsyncpa [#allocation8], 1 }

</bundles_post_ra>
